<compile_context>
chip_gen: v6e
topology: v6e:2x2x1
jax: 0.10.0
libtpu: 0.0.40
codegen_flags: <defaults>
</compile_context>

<pallas_src>
import functools

import jax
import jax.numpy as jnp
from jax import lax
from jax.experimental import pallas as pl
from jax.experimental.pallas import tpu as pltpu

KW = 4       # conv kernel size used by every layer of NLayerDiscriminator
PAD = 2      # ceil((4 - 1) / 2)

TM_TARGET = 512                    # M (spatial rows) tile, multiple of 16 (bf16)
VMEM_LIMIT = 48 * 1024 * 1024      # explicit scoped-VMEM budget (fits v7x's 64 MiB)


def _round_up(x, m):
    return (x + m - 1) // m * m


# ----------------------------- Pallas kernels ------------------------------- #
def _conv_matmul_kernel(p_ref, w_ref, b_ref, *out_refs, fuse_lrelu, emit_stats):
    """One M tile of the im2col conv: (tm, K) @ (K, cp) + bias [+ LeakyReLU].

    p_ref : (tm, k_pad)  bf16 im2col patch tile
    w_ref : (k_pad, cp)  bf16 weights (full K, VMEM-resident across all M tiles)
    b_ref : (1, cp)      f32 bias (zeros when the torch layer has bias=None)
    y_ref : (tm, cp)     bf16 conv output tile (pre-norm for InstanceNorm layers)
    stats_ref (emit_stats only) : (1, 2, cp) f32 per-sample [sum, sum_sq],
        accumulated across the per-sample M tiles (grid axis 1, "arbitrary").
    """
    if emit_stats:
        y_ref, stats_ref = out_refs
        # Hoisted: grid indices must NOT be queried inside a pl.when body.
        t = pl.program_id(1)                 # per-sample M-tile index
    else:
        (y_ref,) = out_refs
        stats_ref = None
        t = None

    acc = jnp.dot(p_ref[...], w_ref[...], preferred_element_type=jnp.float32)
    y = acc + b_ref[...]
    if fuse_lrelu:
        y = jnp.where(y > 0, y, 0.2 * y)     # LeakyReLU(0.2)
    y_bf = y.astype(y_ref.dtype)
    y_ref[...] = y_bf

    if emit_stats:
        # Per-channel partial sums for the two-pass InstanceNorm, computed from
        # the values that pass 2 will actually re-read (bf16-rounded).
        # Padded M rows are exactly zero (zero patches, zero bias for these
        # layers) so they do not perturb the statistics.
        yf = y_bf.astype(jnp.float32)
        ssum = jnp.sum(yf, axis=0, keepdims=True)                 # (1, cp)
        ssq = jnp.sum(yf * yf, axis=0, keepdims=True)             # (1, cp)
        tile_stats = jnp.concatenate([ssum, ssq], axis=0)[None]   # (1, 2, cp)

        @pl.when(t == 0)
        def _():
            stats_ref[...] = jnp.zeros_like(stats_ref)

        stats_ref[...] += tile_stats


def _scale_shift_lrelu_kernel(y_ref, ss_ref, o_ref, *, use_lrelu):
    """Pass 2 of InstanceNorm2d(affine=False) + LeakyReLU(0.2), tiled over M.

    y_ref  : (tm, cp)    bf16 pre-activation conv output tile
    ss_ref : (1, 2, cp)  f32 per-sample [scale, shift] (precomputed once)
    o_ref  : (tm, cp)    bf16 normalized + activated output tile
    """
    y = y_ref[...].astype(jnp.float32)       # (tm, cp)
    ss = ss_ref[...]                         # (1, 2, cp)
    scale = ss[:, 0, :]                      # (1, cp)
    shift = ss[:, 1, :]                      # (1, cp)
    y = y * scale + shift
    if use_lrelu:
        y = jnp.where(y > 0, y, 0.2 * y)
    o_ref[...] = y.astype(o_ref.dtype)


# ----------------------------- JAX glue ------------------------------------- #
def _im2col(x_nhwc, stride):
    """4x4 / pad-2 patches -> (N, Ho*Wo, 16*Cin), plus (Ho, Wo). Input is bf16."""
    n, h, w, c = x_nhwc.shape
    xp = jnp.pad(x_nhwc, ((0, 0), (PAD, PAD), (PAD, PAD), (0, 0)))
    ho = (h + 2 * PAD - KW) // stride + 1
    wo = (w + 2 * PAD - KW) // stride + 1
    cols = []
    for i in range(KW):
        for j in range(KW):
            cols.append(xp[:, i:i + ho * stride:stride, j:j + wo * stride:stride, :])
    patches = jnp.stack(cols, axis=3)                 # (N, Ho, Wo, 16, Cin)
    return patches.reshape(n, ho * wo, KW * KW * c), ho, wo


@functools.partial(jax.jit, static_argnums=(3, 4, 5))
def _conv_layer(x_nhwc, w_oihw, b, stride, use_instnorm, use_lrelu):
    """Conv2d(k=4, pad=2) [+ InstanceNorm] [+ LeakyReLU] via tiled Pallas kernels."""
    n = x_nhwc.shape[0]
    cout, cin = w_oihw.shape[0], w_oihw.shape[1]

    # bf16 BEFORE im2col: the 16x-expanded patch tensor hits HBM at half width.
    patches, ho, wo = _im2col(x_nhwc.astype(jnp.bfloat16), stride)
    m = ho * wo
    k = KW * KW * cin

    # ---- padded / tiled shapes: lane-dense, bf16-tile aligned ----
    tm = min(TM_TARGET, _round_up(m, 16))
    m_pad = _round_up(m, tm)                # per-sample M padded to a multiple of tm
    tiles_per_sample = m_pad // tm
    k_pad = _round_up(k, 128)               # full-K resident (max 8192 -> 8 MiB bf16)
    cp = _round_up(cout, 128)               # lane-dense output channels
    total_m = n * m_pad                     # batch folded into the matmul M axis

    patches = jnp.pad(patches, ((0, 0), (0, m_pad - m), (0, k_pad - k)))
    patches = patches.reshape(total_m, k_pad)                      # bf16
    # (Cout, Cin, KH, KW) -> (KH*KW*Cin, Cout), matching the patch K ordering.
    w_mat = jnp.transpose(w_oihw, (2, 3, 1, 0)).reshape(k, cout)
    w_mat = jnp.pad(w_mat, ((0, k_pad - k), (0, cp - cout))).astype(jnp.bfloat16)
    b_vec = jnp.zeros((1, cp), jnp.float32)
    if b is not None:
        b_vec = b_vec.at[0, :cout].set(b.astype(jnp.float32))

    emit_stats = use_instnorm
    fuse_lrelu = use_lrelu and not use_instnorm

    kernel = functools.partial(_conv_matmul_kernel, fuse_lrelu=fuse_lrelu,
                               emit_stats=emit_stats)

    cost = pl.CostEstimate(
        flops=int(2 * total_m * k_pad * cp),
        transcendentals=0,
        bytes_accessed=int(total_m * k_pad * 2 + k_pad * cp * 2 + total_m * cp * 2
                           + (n * 2 * cp * 4 if emit_stats else 0)))

    y_shape = jax.ShapeDtypeStruct((total_m, cp), jnp.bfloat16)
    y_spec_2d = None

    if emit_stats:
        # Batch axis "parallel" (megacore split on v7x); the per-sample M-tile axis
        # revisits the stats block so it must be "arbitrary".
        grid = (n, tiles_per_sample)
        in_specs = [
            pl.BlockSpec((tm, k_pad), lambda s, t: (s * tiles_per_sample + t, 0)),
            pl.BlockSpec((k_pad, cp), lambda s, t: (0, 0)),
            pl.BlockSpec((1, cp), lambda s, t: (0, 0)),
        ]
        out_shape = (y_shape, jax.ShapeDtypeStruct((n, 2, cp), jnp.float32))
        out_specs = (
            pl.BlockSpec((tm, cp), lambda s, t: (s * tiles_per_sample + t, 0)),
            pl.BlockSpec((1, 2, cp), lambda s, t: (s, 0, 0)),
        )
        dims = ("parallel", "arbitrary")
    else:
        grid = (total_m // tm,)
        in_specs = [
            pl.BlockSpec((tm, k_pad), lambda i: (i, 0)),
            pl.BlockSpec((k_pad, cp), lambda i: (0, 0)),
            pl.BlockSpec((1, cp), lambda i: (0, 0)),
        ]
        out_shape = y_shape
        out_specs = pl.BlockSpec((tm, cp), lambda i: (i, 0))
        dims = ("parallel",)

    result = pl.pallas_call(
        kernel,
        out_shape=out_shape,
        grid=grid,
        in_specs=in_specs,
        out_specs=out_specs,
        compiler_params=pltpu.CompilerParams(
            dimension_semantics=dims, vmem_limit_bytes=VMEM_LIMIT),
        cost_estimate=cost,
    )(patches, w_mat, b_vec)

    if emit_stats:
        y2d, stats = result
        # Per-sample scale/shift computed once from the tiny (n, 2, cp) stats;
        # pass 2 is then a pure FMA + LeakyReLU per tile (no per-tile rsqrt).
        inv_hw = 1.0 / float(m)
        mean = stats[:, 0, :] * inv_hw
        var = jnp.maximum(stats[:, 1, :] * inv_hw - mean * mean, 0.0)  # biased var
        scale = lax.rsqrt(var + 1e-5)
        shift = -mean * scale
        ss = jnp.stack([scale, shift], axis=1)                         # (n, 2, cp)

        y2d = pl.pallas_call(
            functools.partial(_scale_shift_lrelu_kernel, use_lrelu=use_lrelu),
            out_shape=jax.ShapeDtypeStruct((total_m, cp), jnp.bfloat16),
            grid=(n, tiles_per_sample),
            in_specs=[
                pl.BlockSpec((tm, cp), lambda s, t: (s * tiles_per_sample + t, 0)),
                pl.BlockSpec((1, 2, cp), lambda s, t: (s, 0, 0)),
            ],
            out_specs=pl.BlockSpec((tm, cp),
                                   lambda s, t: (s * tiles_per_sample + t, 0)),
            compiler_params=pltpu.CompilerParams(
                dimension_semantics=("parallel", "parallel"),
                vmem_limit_bytes=VMEM_LIMIT),
            cost_estimate=pl.CostEstimate(
                flops=int(2 * total_m * cp), transcendentals=0,
                bytes_accessed=int(2 * total_m * cp * 2 + n * 2 * cp * 4)),
        )(y2d, ss)
    else:
        y2d = result

    y = y2d.reshape(n, m_pad, cp)
    if m_pad != m or cp != cout:                 # skip the slice-copy when a no-op
        y = y[:, :m, :cout]
    return y.reshape(n, ho, wo, cout)            # bf16 activations flow onward


def _avgpool3x3_s2(x_nhwc):
    """nn.AvgPool2d(3, stride=2, padding=1, count_include_pad=False)."""
    dims, strides = (1, 3, 3, 1), (1, 2, 2, 1)
    pads = ((0, 0), (1, 1), (1, 1), (0, 0))
    ssum = lax.reduce_window(x_nhwc, 0.0, lax.add, dims, strides, pads)
    ones = jnp.ones((1,) + x_nhwc.shape[1:3] + (1,), x_nhwc.dtype)
    cnt = lax.reduce_window(ones, 0.0, lax.add, dims, strides, pads)
    return ssum / cnt


def _spectral_normalize(w_oihw, n_iter=30, eps=1e-12):
    """Divide conv weight by its spectral norm (converged power iteration)."""
    # TODO(synk): PyTorch spectral_norm keeps stateful u/v buffers and runs a single
    # power-iteration step per forward; here we use the converged sigma instead.
    cout = w_oihw.shape[0]
    wm = w_oihw.reshape(cout, -1)
    u = jnp.ones((cout,), jnp.float32)
    u = u / (jnp.linalg.norm(u) + eps)
    for _ in range(n_iter):
        v = wm.T @ u
        v = v / (jnp.linalg.norm(v) + eps)
        u = wm @ v
        u = u / (jnp.linalg.norm(u) + eps)
    sigma = u @ (wm @ v)
    return w_oihw / sigma


# ----------------------------- Parameters ----------------------------------- #
def make_nlayer_params(key, input_nc, ndf, n_layers):
    """Layer configs matching NLayerDiscriminator(..., 'spectralinstance')."""
    layers = []
    kw_std = 0.05

    def _conv_init(key, cout, cin):
        kw_key, b_key = jax.random.split(key)
        w = jax.random.normal(kw_key, (cout, cin, KW, KW), jnp.float32) * kw_std
        b = jax.random.normal(b_key, (cout,), jnp.float32) * kw_std
        return w, b

    keys = jax.random.split(key, n_layers + 2)
    # layer 0: plain conv (with bias), stride 2, LeakyReLU
    w, b = _conv_init(keys[0], ndf, input_nc)
    layers.append(dict(w=w, b=b, stride=2, instnorm=False, lrelu=True))
    nf = ndf
    # layers 1 .. n_layers-1: spectral conv (no bias) + InstanceNorm + LeakyReLU, stride 2
    for n in range(1, n_layers):
        nf_prev, nf = nf, min(nf * 2, 512)
        w, _ = _conv_init(keys[n], nf, nf_prev)
        layers.append(dict(w=_spectral_normalize(w), b=None, stride=2,
                           instnorm=True, lrelu=True))
    # layer n_layers: spectral conv (no bias) + InstanceNorm + LeakyReLU, stride 1
    nf_prev, nf = nf, min(nf * 2, 512)
    w, _ = _conv_init(keys[n_layers], nf, nf_prev)
    layers.append(dict(w=_spectral_normalize(w), b=None, stride=1,
                       instnorm=True, lrelu=True))
    # final layer: plain conv to 1 channel (with bias), stride 1, no activation
    w, b = _conv_init(keys[n_layers + 1], 1, nf)
    layers.append(dict(w=w, b=b, stride=1, instnorm=False, lrelu=False))
    return layers


def make_multiscale_params(key, input_nc, ndf, n_layers, num_D):
    keys = jax.random.split(key, num_D)
    return [make_nlayer_params(keys[d], input_nc, ndf, n_layers) for d in range(num_D)]


# ----------------------------- Forward pass --------------------------------- #
def singleD_forward(layers, x_nhwc):
    """NLayerDiscriminator forward with getIntermFeat=True: return all features."""
    feats = []
    cur = x_nhwc
    for lyr in layers:
        cur = _conv_layer(cur, lyr["w"], lyr["b"], lyr["stride"],
                          lyr["instnorm"], lyr["lrelu"])
        feats.append(cur)
    return feats


def multiscale_discriminator_forward(params, x_nchw, num_D):
    """Matches MultiscaleDiscriminator.forward (getIntermFeat=True).

    Returns: list (len num_D) of lists (len n_layers+2) of NCHW f32 feature maps.
    result[i] uses discriminator `num_D - 1 - i` on the i-times-downsampled input.
    """
    x = jnp.transpose(x_nchw, (0, 2, 3, 1)).astype(jnp.float32)  # NCHW -> NHWC once
    result = []
    for i in range(num_D):
        feats = singleD_forward(params[num_D - 1 - i], x)
        # only the returned features go back to NCHW / f32 (no internal round trips)
        result.append([jnp.transpose(f, (0, 3, 1, 2)).astype(jnp.float32)
                       for f in feats])
        if i != num_D - 1:
            x = _avgpool3x3_s2(x)
    return result


# --------------------------------- Main ------------------------------------- #
if __name__ == "__main__":
    INPUT_NC, NDF, N_LAYERS, NUM_D = 4, 8, 3, 2
    N, H, W = 2, 16, 16

    key = jax.random.PRNGKey(0)
    pkey, xkey = jax.random.split(key)
    params = make_multiscale_params(pkey, INPUT_NC, NDF, N_LAYERS, NUM_D)
    x = jax.random.normal(xkey, (N, INPUT_NC, H, W), jnp.float32)

    out = multiscale_discriminator_forward(params, x, NUM_D)
    jax.block_until_ready(jax.tree_util.tree_leaves(out))

    # sanity: num_D scales, each with n_layers + 2 intermediate features
    assert len(out) == NUM_D
    assert all(len(scale) == N_LAYERS + 2 for scale in out)
    assert out[0][-1].shape[1] == 1   # final PatchGAN map has 1 channel

    print("KERNEL_OK")
</pallas_src>

<mosaic_0001>
module attributes {stable_mosaic.version = 11 : i64} {
  func.func @_conv_matmul_kernel(%arg0: i32, %arg1: memref<96x128xbf16, #tpu.memory_space<vmem>>, %arg2: memref<128x128xbf16, #tpu.memory_space<vmem>>, %arg3: memref<1x128xf32, #tpu.memory_space<vmem>>, %arg4: memref<96x128xbf16, #tpu.memory_space<vmem>>) attributes {dimension_semantics = [#tpu.dimension_semantics<parallel>], iteration_bounds = array<i64: 2>, scalar_prefetch = 0 : i64, scratch_operands = 0 : i64, tpu.core_type = #tpu.core_type<tc>, window_params = [{transform_indices = @transform_0, window_bounds = array<i64: 96, 128>}, {pipeline_mode = #tpu.pipeline_mode<synchronous>, transform_indices = @transform_1, window_bounds = array<i64: 128, 128>}, {pipeline_mode = #tpu.pipeline_mode<synchronous>, transform_indices = @transform_2, window_bounds = array<i64: 1, 128>}, {transform_indices = @transform_3, window_bounds = array<i64: 96, 128>}]} {
    %c0 = arith.constant 0 : index
    %c0_0 = arith.constant 0 : index
    %0 = vector.load %arg1[%c0, %c0_0] : memref<96x128xbf16, #tpu.memory_space<vmem>>, vector<96x128xbf16>
    %c0_1 = arith.constant 0 : index
    %c0_2 = arith.constant 0 : index
    %1 = vector.load %arg2[%c0_1, %c0_2] : memref<128x128xbf16, #tpu.memory_space<vmem>>, vector<128x128xbf16>
    %cst = arith.constant dense<0.000000e+00> : vector<96x128xf32>
    %2 = tpu.matmul %0, %1, %cst {dimension_numbers = #tpu.dot_dimension_numbers<[1], [0], [0], [1], [0, 0, 1, 1], [], []>} : vector<96x128xbf16>, vector<128x128xbf16>, vector<96x128xf32> -> vector<96x128xf32>
    %c0_3 = arith.constant 0 : index
    %c0_4 = arith.constant 0 : index
    %3 = vector.load %arg3[%c0_3, %c0_4] : memref<1x128xf32, #tpu.memory_space<vmem>>, vector<1x128xf32>
    %4 = vector.broadcast %3 : vector<1x128xf32> to vector<96x128xf32>
    %5 = arith.addf %2, %4 : vector<96x128xf32>
    %cst_5 = arith.constant 0.000000e+00 : f32
    %6 = vector.broadcast %cst_5 : f32 to vector<96x128xf32>
    %7 = arith.cmpf ogt, %5, %6 : vector<96x128xf32>
    %cst_6 = arith.constant 2.000000e-01 : f32
    %8 = vector.broadcast %cst_6 : f32 to vector<96x128xf32>
    %9 = arith.mulf %8, %5 : vector<96x128xf32>
    %10 = arith.select %7, %5, %9 : vector<96x128xi1>, vector<96x128xf32>
    %11 = arith.truncf %10 : vector<96x128xf32> to vector<96x128xbf16>
    %c0_7 = arith.constant 0 : index
    %c0_8 = arith.constant 0 : index
    %12 = vector.load %arg4[%c0_7, %c0_8] : memref<96x128xbf16, #tpu.memory_space<vmem>>, vector<96x128xbf16>
    tpu.vector_store %arg4[%c0_7, %c0_8], %11 {strides = array<i32>} : memref<96x128xbf16, #tpu.memory_space<vmem>>, vector<96x128xbf16>,
    return
  }
  func.func @transform_0(%arg0: i32) -> (i32, i32) {
    %c0_i32 = arith.constant 0 : i32
    %c0_i32_0 = arith.constant 0 : i32
    return %arg0, %c0_i32 : i32, i32
  }
  func.func @transform_1(%arg0: i32) -> (i32, i32) {
    %c0_i32 = arith.constant 0 : i32
    %c0_i32_0 = arith.constant 0 : i32
    %c0_i32_1 = arith.constant 0 : i32
    return %c0_i32, %c0_i32_0 : i32, i32
  }
  func.func @transform_2(%arg0: i32) -> (i32, i32) {
    %c0_i32 = arith.constant 0 : i32
    %c0_i32_0 = arith.constant 0 : i32
    %c0_i32_1 = arith.constant 0 : i32
    return %c0_i32, %c0_i32_0 : i32, i32
  }
  func.func @transform_3(%arg0: i32) -> (i32, i32) {
    %c0_i32 = arith.constant 0 : i32
    %c0_i32_0 = arith.constant 0 : i32
    return %arg0, %c0_i32 : i32, i32
  }
}

</mosaic_0001>

<bundles_post_ra>
// kernel: _conv_layer.1
= control target key start
LH: loop header
LB: loop body
LE: loop exit
PB: predicated region body
PF: predicated region fallthrough
CT: control target
= control target key end

     0   :  { %s718_s12 = smov 0   ;;  %s786_s0 = inlined_call_operand.vmem [shape: bf16[192,128], index: 0, kind: input, shape index: {}]   ;;  %s787_s1 = inlined_call_operand.vmem [shape: bf16[128,128], index: 1, kind: input, shape index: {}]   ;;  %s788_s2 = inlined_call_operand.vmem [shape: f32[1,128], index: 2, kind: input, shape index: {}]   ;;  %s789_s3 = inlined_call_operand.vmem [shape: bf16[192,128], index: 3, kind: output, shape index: {}]  }
   0x1 LB: > { %s527_s13 = sadd.s32 4294967295, %s696_s12   ;;  %p531_p0 = scmp.ge.s32.totalorder %s696_s12, 1  ;;  %s696_s12 = sphi %s718_s12, %s13_s12  }
   0x2   : > { %p138_p1 = scmp.lt.s32.totalorder %s696_s12, 3 }
   0x4   : > { %p139_p2 = pnand %p531_p0, %p138_p1 }
   0x5   : > { %s162_s16 = smul.u32 (!%p139_p2), 12, %s527_s13 }
   0x6   : > { %142 = sbr.rel (%p139_p2) target bundleno = 259 (0x103), region = 32 }
   0x7   : > { %p163_p3 = scmp.lt.s32.totalorder (!%p139_p2), %s162_s16, 23 }
   0xb   : > { %v676_v0 = vld [vmem:[%s787_s1 + $0x38] sm:$0xff]   ;;  %v677_v1 = vld [vmem:[%s787_s1 + $0x30] sm:$0xff]   ;;  %v678_v2 = vld [vmem:[%s787_s1 + $0x28] sm:$0xff]   ;;  %s791_s16 = smov (!%p163_p3, %s162_s16), 23 }
   0xc   : > { %624 = vmatprep.subr.bf16.mxu0 %v676_v0  ;;  %652 = vmatprep.subr.bf16.mxu1 %v676_v0  ;;  %s532_s21 = sshll.u32 %s791_s16, 2  ;;  %v679_v3 = vld [vmem:[%s787_s1 + $0x20] sm:$0xff]   ;;  %v680_v6 = vld [vmem:[%s787_s1 + $0x18] sm:$0xff]   ;;  %v681_v7 = vld [vmem:[%s787_s1 + $0x10] sm:$0xff]  }
   0xd   : > { %625 = vmatpush3.bf16.msra.mxu0 %v676_v0  ;;  %660 = vmatpush3.bf16.msra.mxu1 %v676_v0  ;;  %s746_s26 = scalar_lea.vmem %s786_s0, %s532_s21  ;;  %v682_v8 = vld [vmem:[%s787_s1 + $0x8] sm:$0xff]   ;;  %v683_v9 = vld [vmem:[%s787_s1] sm:$0xff]   ;;  %s774_s13 = scalar_lea.vmem %s789_s3, %s532_s21 }
   0xe   : > { %626 = vmatprep.subr.bf16.mxu0 %v677_v1  ;;  %653 = vmatprep.subr.bf16.mxu1 %v677_v1  ;;  %v684_v4 = vld [vmem:[%s746_s26] sm:$0xff]   ;;  %v685_v5 = vld [vmem:[%s746_s26 + $0x10] sm:$0xff]   ;;  %v686_v10 = vld [vmem:[%s746_s26 + $0x8] sm:$0xff]  }
   0xf   : > { %640 = vmatprep.mubr.bf16.mxu0 %v684_v4  ;;  %644 = vmatprep.mubr.bf16.mxu1 %v685_v5  ;;  %v687_v11 = vld [vmem:[%s746_s26 + $0x18] sm:$0xff]   ;;  %v688_v12 = vld [vmem:[%s746_s26 + $0x20] sm:$0xff]   ;;  %v689_v13 = vld [vmem:[%s746_s26 + $0x28] sm:$0xff]  }
  0x10   : > { %v534_v14 = vld [vmem:[%s788_s2] ss:$0 sm:$0xff] }
  0x11   : > { %627 = vmatpush3.bf16.msra.mxu0 %v677_v1  ;;  %661 = vmatpush3.bf16.msra.mxu1 %v677_v1 }
  0x12   : > { %628 = vmatprep.subr.bf16.mxu0 %v678_v2  ;;  %654 = vmatprep.subr.bf16.mxu1 %v678_v2 }
  0x15   : > { %629 = vmatpush3.bf16.msra.mxu0 %v678_v2  ;;  %662 = vmatpush3.bf16.msra.mxu1 %v678_v2 }
  0x16   : > { %630 = vmatprep.subr.bf16.mxu0 %v679_v3  ;;  %655 = vmatprep.subr.bf16.mxu1 %v679_v3 }
  0x19   : > { %631 = vmatpush3.bf16.msra.mxu0 %v679_v3  ;;  %663 = vmatpush3.bf16.msra.mxu1 %v679_v3 }
  0x1a   : > { %632 = vmatprep.subr.bf16.mxu0 %v680_v6  ;;  %656 = vmatprep.subr.bf16.mxu1 %v680_v6 }
  0x1d   : > { %633 = vmatpush3.bf16.msra.mxu0 %v680_v6  ;;  %664 = vmatpush3.bf16.msra.mxu1 %v680_v6 }
  0x1e   : > { %634 = vmatprep.subr.bf16.mxu0 %v681_v7  ;;  %657 = vmatprep.subr.bf16.mxu1 %v681_v7 }
  0x21   : > { %635 = vmatpush3.bf16.msra.mxu0 %v681_v7  ;;  %665 = vmatpush3.bf16.msra.mxu1 %v681_v7 }
  0x22   : > { %636 = vmatprep.subr.bf16.mxu0 %v682_v8  ;;  %658 = vmatprep.subr.bf16.mxu1 %v682_v8 }
  0x25   : > { %637 = vmatpush3.bf16.msra.mxu0 %v682_v8  ;;  %666 = vmatpush3.bf16.msra.mxu1 %v682_v8 }
  0x26   : > { %638 = vmatprep.subr.bf16.mxu0 %v683_v9  ;;  %659 = vmatprep.subr.bf16.mxu1 %v683_v9 }
  0x29   : > { %639 = vmatpush3.bf16.msra.mxu0 %v683_v9  ;;  %667 = vmatpush3.bf16.msra.mxu1 %v683_v9 }
  0x2c   : > { %641 = vmatmul.mubr.bf16.vlgmr.msra.gmra.mxu0 %v686_v10  ;;  %645 = vmatmul.mubr.bf16.vlgmr.msra.gmra.mxu1 %v687_v11 }
  0x2d   : > { %648 = vmatprep.mubr.bf16.mxu1 %v688_v12 }
  0x34   : > { %649 = vmatmul.mubr.bf16.gmra.mxu1 %v689_v13 }
  0xec   : > { %v642_v15 = vpop.f32.mrf.mxu0  ;;  %v646_v16 = vpop.f32.mrf.mxu1 }
  0xed   : > { %v337_v17 = vadd.f32 %v642_v15, %v534_v14  ;;  %v353_v18 = vadd.f32 %v646_v16, %v534_v14 }
  0xee   : > { %v328_v19 = vpop.f32.mrf.mxu0  ;;  %v344_v20 = vpop.f32.mrf.mxu1 }
  0xef   : > { %vm377_vm0 = vcmp.gt.f32.partialorder %v337_v17, 0.0  ;;  %v389_v21 = vmul.f32 0.2, %v337_v17  ;;  %vm381_vm1 = vcmp.gt.f32.partialorder %v353_v18, 0.0  ;;  %v393_v22 = vmul.f32 0.2, %v353_v18 }
  0xf0   : > { %v329_v23 = vadd.f32 %v534_v14, %v328_v19  ;;  %v345_v24 = vadd.f32 %v534_v14, %v344_v20  ;;  %v643_v25 = vpop.f32.mrf.mxu0  ;;  %v647_v26 = vpop.f32.mrf.mxu1 }
  0xf1   : > { %v340_v27 = vadd.f32 %v643_v25, %v534_v14  ;;  %v356_v28 = vadd.f32 %v647_v26, %v534_v14  ;;  %v401_v29 = vsel %vm377_vm0, %v337_v17, %v389_v21  ;;  %v405_v30 = vsel %vm381_vm1, %v353_v18, %v393_v22 }
  0xf2   : > { %vm375_vm2 = vcmp.gt.f32.partialorder %v329_v23, 0.0  ;;  %v387_v31 = vmul.f32 0.2, %v329_v23  ;;  %v331_v32 = vpop.f32.mrf.mxu0  ;;  %v347_v33 = vpop.f32.mrf.mxu1  ;;  %vm379_vm5 = vcmp.gt.f32.partialorder %v345_v24, 0.0  ;;  %v391_v36 = vmul.f32 0.2, %v345_v24 }
  0xf3   : > { %vm378_vm3 = vcmp.gt.f32.partialorder %v340_v27, 0.0  ;;  %v390_v34 = vmul.f32 0.2, %v340_v27  ;;  %vm382_vm4 = vcmp.gt.f32.partialorder %v356_v28, 0.0  ;;  %v394_v35 = vmul.f32 0.2, %v356_v28 }
  0xf4   : > { %v332_v37 = vadd.f32 %v534_v14, %v331_v32  ;;  %v348_v38 = vadd.f32 %v534_v14, %v347_v33  ;;  %v650_v39 = vpop.f32.mrf.mxu1  ;;  %v399_v40 = vsel %vm375_vm2, %v329_v23, %v387_v31  ;;  %v403_v49 = vsel %vm379_vm5, %v345_v24, %v391_v36 }
  0xf5   : > { %v402_v41 = vsel %vm378_vm3, %v340_v27, %v390_v34  ;;  %v406_v42 = vsel %vm382_vm4, %v356_v28, %v394_v35  ;;  %v369_v43 = vadd.f32 %v650_v39, %v534_v14 }
  0xf6   : > { %v583_v44 = vpack.c.bf16 %v402_v41, %v401_v29  ;;  %v593_v45 = vpack.c.bf16 %v406_v42, %v405_v30  ;;  %vm376_vm6 = vcmp.gt.f32.partialorder %v332_v37, 0.0  ;;  %v388_v46 = vmul.f32 0.2, %v332_v37  ;;  %v360_v47 = vpop.f32.mrf.mxu1 }
  0xf7   : > { %vm380_vm7 = vcmp.gt.f32.partialorder %v348_v38, 0.0  ;;  %v392_v48 = vmul.f32 0.2, %v348_v38  ;;  %v361_v51 = vadd.f32 %v534_v14, %v360_v47  ;;  %v397_v55 = vmul.f32 0.2, %v369_v43 }
  0xf8   : > { %605 = vst [vmem:[%s774_s13 + $0x8] sm:$0xff] %v583_v44   ;;  %607 = vst [vmem:[%s774_s13 + $0x18] sm:$0xff] %v593_v45   ;;  %v400_v50 = vsel %vm376_vm6, %v332_v37, %v388_v46  ;;  %v651_v52 = vpop.f32.mrf.mxu1  ;;  %vm385_vm8 = vcmp.gt.f32.partialorder %v369_v43, 0.0 }
  0xf9   : > { %v578_v53 = vpack.c.bf16 %v400_v50, %v399_v40  ;;  %v404_v54 = vsel %vm380_vm7, %v348_v38, %v392_v48  ;;  %v372_v56 = vadd.f32 %v651_v52, %v534_v14  ;;  %v395_v59 = vmul.f32 0.2, %v361_v51 }
  0xfa   : > { %v588_v57 = vpack.c.bf16 %v404_v54, %v403_v49  ;;  %v363_v58 = vpop.f32.mrf.mxu1  ;;  %vm383_vm10 = vcmp.gt.f32.partialorder %v361_v51, 0.0  ;;  %v409_v62 = vsel %vm385_vm8, %v369_v43, %v397_v55 }
  0xfb   : > { %579 = vst [vmem:[%s774_s13] sm:$0xff] %v578_v53   ;;  %vm386_vm9 = vcmp.gt.f32.partialorder %v372_v56, 0.0  ;;  %v398_v60 = vmul.f32 0.2, %v372_v56  ;;  %v364_v61 = vadd.f32 %v534_v14, %v363_v58  ;;  %v407_v2 = vsel %vm383_vm10, %v361_v51, %v395_v59 }
  0xfc   : > { %606 = vst [vmem:[%s774_s13 + $0x10] sm:$0xff] %v588_v57  }
  0xfd   : > { %v410_v63 = vsel %vm386_vm9, %v372_v56, %v398_v60  ;;  %vm384_vm11 = vcmp.gt.f32.partialorder %v364_v61, 0.0  ;;  %v396_v0 = vmul.f32 0.2, %v364_v61 }
  0xfe   : > { %v603_v1 = vpack.c.bf16 %v410_v63, %v409_v62 }
  0xff   : > { %v408_v3 = vsel %vm384_vm11, %v364_v61, %v396_v0 }
 0x100   : > { %609 = vst [vmem:[%s774_s13 + $0x28] sm:$0xff] %v603_v1   ;;  %v598_v4 = vpack.c.bf16 %v408_v3, %v407_v2 }
 0x102   : > { %608 = vst [vmem:[%s774_s13 + $0x20] sm:$0xff] %v598_v4  }
 0x103 PF: > { %s13_s12 = sadd.s32 1, %s696_s12  }
 0x104   : > { %p10_p4 = scmp.ge.s32.totalorder %s13_s12, 4  }
 0x106   :  { %12 = sbr.rel (!%p10_p4) target bundleno = 1 (0x1), region = 62 }

</bundles_post_ra>
